<compile_context>
chip_gen: v7x
topology: tpu7x:2x2x1
jax: 0.10.0
libtpu: 0.0.40
codegen_flags: <defaults>
</compile_context>

<pallas_src>
import functools
import logging

import numpy as np
import jax
import jax.numpy as jnp
from jax.experimental import pallas as pl
from jax.experimental.pallas import tpu as pltpu

logger = logging.getLogger(__name__)


# ----------------------------- tiling helpers ------------------------------ #

_LANE = 128                 # vreg lane width
_MAX_TILE_LANES = 2048      # lane-dense tile width when the view has many rows
_MAX_TILE_BYTES = 8 << 20   # 8 MiB/tile: with double-buffered in+out that is
                            # ~32 MiB resident, inside v7x's 64 MiB/TC VMEM.


def _sublane_multiple(dtype) -> int:
    """Sublane packing factor: 8 for 32-bit, 16 for 16-bit, 32 for 8-bit."""
    itemsize = np.dtype(dtype).itemsize
    if itemsize >= 4:
        return 8
    if itemsize == 2:
        return 16
    return 32


def _lane_dense_width(total: int, cap: int = _MAX_TILE_LANES) -> int:
    """Largest multiple of 128 dividing `total`, at most `cap`.

    `total` is guaranteed to be a multiple of 128 by the caller, so the search
    always succeeds (128 at worst).
    """
    c = (min(cap, total) // _LANE) * _LANE
    while c >= _LANE:
        if total % c == 0:
            return c
        c -= _LANE
    return _LANE


def _pick_tiles(rows: int, cols: int, dtype):
    """Largest legal (tile_r, tile_c) within the VMEM byte budget.

    Legality: each of the last two block dims is a multiple of the
    (sublane, lane) unit OR equals the full array dim on that axis.
    """
    itemsize = np.dtype(dtype).itemsize
    sub = _sublane_multiple(dtype)
    budget_elems = _MAX_TILE_BYTES // itemsize

    # Lane (last) dim.
    if rows < sub:
        # Degenerate few-row view: spend the whole byte budget on lane width
        # (multiple of 128) instead of capping at _MAX_TILE_LANES.
        lane_cap = max(_LANE, (budget_elems // max(rows, 1)) // _LANE * _LANE)
    else:
        lane_cap = _MAX_TILE_LANES
    tile_c = cols if cols <= lane_cap else lane_cap

    # Sublane (second-last) dim: as many rows as fit the budget (multiple of sub).
    row_cap = max(sub, (budget_elems // max(tile_c, 1)) // sub * sub)
    # v7x: keep >= 2 steps on the leading ("parallel") grid axis so both
    # TensorCores get work; costs nothing on single-TC v5e/v6e.
    if rows >= 2 * sub:
        row_cap = min(row_cap, max(sub, (rows // 2) // sub * sub))
    tile_r = rows if rows <= row_cap else row_cap
    return tile_r, tile_c


# ------------------------------ Pallas kernel ------------------------------ #

def _copy_kernel(x_ref, o_ref):
    # Hot path of the (abstract) forward: pass the neural input through.
    o_ref[...] = x_ref[...]


def _pallas_identity_2d(x2d, *, alias: bool = False):
    """Tiled, pipelined identity over a lane-dense 2-D view."""
    R, C = x2d.shape
    itemsize = np.dtype(x2d.dtype).itemsize
    tile_r, tile_c = _pick_tiles(R, C, x2d.dtype)

    grid_r = pl.cdiv(R, tile_r)
    grid_c = pl.cdiv(C, tile_c)

    if grid_c == 1:
        # Lane axis fits in one block: collapse to a 1-D grid (drops a trivial
        # inner loop axis and its per-step index bookkeeping).
        grid = (grid_r,)
        in_specs = [pl.BlockSpec((tile_r, C), lambda i: (i, 0))]
        out_specs = pl.BlockSpec((tile_r, C), lambda i: (i, 0))
        semantics = ("parallel",)
        tile_bytes = tile_r * C * itemsize
    else:
        grid = (grid_r, grid_c)
        in_specs = [pl.BlockSpec((tile_r, tile_c), lambda i, j: (i, j))]
        out_specs = pl.BlockSpec((tile_r, tile_c), lambda i, j: (i, j))
        semantics = ("parallel", "parallel")
        tile_bytes = tile_r * tile_c * itemsize

    # 1 input + 1 output, double-buffered by the pipeline -> ~4 x tile resident;
    # budget 6x with a floor, clamped so it is valid even on v7x (64 MiB/TC).
    vmem_limit = int(min(48 << 20, max(16 << 20, 6 * tile_bytes)))

    return pl.pallas_call(
        _copy_kernel,
        out_shape=jax.ShapeDtypeStruct((R, C), x2d.dtype),
        grid_spec=pltpu.PrefetchScalarGridSpec(
            num_scalar_prefetch=0,
            grid=grid,
            in_specs=in_specs,
            out_specs=out_specs,
        ),
        compiler_params=pltpu.CompilerParams(
            dimension_semantics=semantics,
            vmem_limit_bytes=vmem_limit,
        ),
        cost_estimate=pl.CostEstimate(
            flops=0,
            transcendentals=0,
            bytes_accessed=2 * R * C * itemsize,
        ),
        # P8: let the output reuse the input HBM buffer (effective only when
        # the caller donates the input, see _make_identity_fn).
        input_output_aliases=({0: 0} if alias else {}),
    )(x2d)


# ------------------------- cached, jitted forward -------------------------- #

@functools.lru_cache(maxsize=None)
def _make_identity_fn(shape, dtype, alias):
    """Build & jit the identity forward for a given (shape, dtype, alias)."""
    total = int(np.prod(shape)) if len(shape) else 1
    sub = _sublane_multiple(dtype)
    unit = sub * _LANE

    # Lane-dense plan (all static, decided at trace time):
    #   - pad the flattened tensor to a multiple of sublane*128 when needed so
    #     stores are always unmasked full-width vst and DMA rows are dense,
    #   - choose the widest lane count (multiple of 128, <= 2048) dividing it.
    pad_total = total if total % _LANE == 0 else ((total + unit - 1) // unit) * unit
    width = _lane_dense_width(pad_total)
    rows = pad_total // width

    def fn(x):
        flat = x.reshape((total,))
        if pad_total != total:
            flat = jnp.pad(flat, (0, pad_total - total))
        y2d = _pallas_identity_2d(flat.reshape((rows, width)), alias=alias)
        y = y2d.reshape((pad_total,))
        if pad_total != total:
            y = y[:total]
        return y.reshape(shape)

    # With alias=True the caller's buffer is donated so the pallas output can
    # alias it (no fresh HBM allocation for a pure identity).
    return jax.jit(fn, donate_argnums=(0,) if alias else ())


# ------------------------------- Model class ------------------------------- #

class AbstractModel:
    """
    JAX/Pallas port of paragen AbstractModel: interface-only base class.

    Args:
        path: path to restore checkpoints (kept for API parity; unused).
    """

    def __init__(self, path=None):
        self._path = path
        self._mode = "train"
        self._states = {}
        self._params = {}  # abstract model declares no parameters

    # -- build / persistence stubs -- #
    def build(self, *args, **kwargs):
        self._build(*args, **kwargs)
        n_params = sum(int(np.prod(p.shape)) for p in self._params.values())
        logger.info("parameter size: %d", n_params)
        # TODO(synk): checkpoint restore (torch.load via UniIO) and cuda device
        # movement have no Pallas equivalent and are intentionally omitted.

    def _build(self, *args, **kwargs):
        # Abstract in the reference; nothing to build here.
        pass

    def load(self, path, device=None, strict=False):
        # TODO(synk): torch.load / load_state_dict has no Pallas equivalent.
        pass

    def save(self, path):
        # TODO(synk): save_ckpt(state_dict) has no Pallas equivalent.
        pass

    def forward(self, x, alias_output=False):
        """
        Abstract forward.  The reference raises NotImplementedError; here we
        expose the identity contract on the neural input, routed through a
        jitted Pallas TPU kernel so derived models inherit a working kernel
        path.  With alias_output=True the input buffer is donated and the
        output aliases it (zero extra HBM allocation for a true identity).
        """
        x = jnp.asarray(x)
        fn = _make_identity_fn(
            tuple(int(d) for d in x.shape), np.dtype(x.dtype), bool(alias_output)
        )
        return fn(x)

    def __call__(self, x, **kwargs):
        return self.forward(x, **kwargs)

    def update_states(self, **kwargs):
        self._states.update(kwargs)

    @property
    def states(self):
        return self._states

    def reset(self, *args, **kwargs):
        pass

    def is_pretrained(self):
        return self._path is not None


# ---------------------------------- main ----------------------------------- #

if __name__ == "__main__":
    model = AbstractModel(path=None)
    model.build()

    key = jax.random.PRNGKey(0)
    k1, k2, k3 = jax.random.split(key, 3)

    # 1) Lane-dense path: small NCHW input, total divisible by 128.
    x = jax.random.normal(k1, (2, 4, 16, 16), dtype=jnp.float32)
    y = jax.block_until_ready(model(x))
    assert y.shape == x.shape and y.dtype == x.dtype
    assert bool(jnp.array_equal(y, x)), "identity mismatch (lane-dense path)"

    # 2) Pad-and-slice path: total not divisible by 128, 16-bit dtype.
    xb = jax.random.normal(k2, (2, 3, 5, 7)).astype(jnp.bfloat16)
    yb = jax.block_until_ready(model(xb))
    assert yb.shape == xb.shape and yb.dtype == xb.dtype
    assert bool(jnp.array_equal(yb, xb)), "identity mismatch (padded path)"

    # 3) Multi-step parallel grid (>= 2 steps for v7x's 2 TCs) + aliased output
    #    with buffer donation; compare against a host copy since xc is donated.
    xc = jax.random.normal(k3, (4, 8, 64, 128), dtype=jnp.float32)
    xc_host = np.asarray(xc)
    yc = jax.block_until_ready(model(xc, alias_output=True))
    assert yc.shape == xc_host.shape and yc.dtype == jnp.float32
    assert np.array_equal(np.asarray(yc), xc_host), "identity mismatch (aliased path)"

    print("KERNEL_OK")
</pallas_src>

<mosaic_0001>
module attributes {stable_mosaic.version = 11 : i64} {
  func.func @_copy_kernel(%arg0: i32, %arg1: memref<1x2048xf32, #tpu.memory_space<vmem>>, %arg2: memref<1x2048xf32, #tpu.memory_space<vmem>>) attributes {dimension_semantics = [#tpu.dimension_semantics<parallel>], iteration_bounds = array<i64: 1>, scalar_prefetch = 0 : i64, scratch_operands = 0 : i64, tpu.core_type = #tpu.core_type<tc>, window_params = [{transform_indices = @transform_0, window_bounds = array<i64: 1, 2048>}, {transform_indices = @transform_1, window_bounds = array<i64: 1, 2048>}]} {
    %c0 = arith.constant 0 : index
    %c0_0 = arith.constant 0 : index
    %0 = vector.load %arg1[%c0, %c0_0] : memref<1x2048xf32, #tpu.memory_space<vmem>>, vector<1x2048xf32>
    %c0_1 = arith.constant 0 : index
    %c0_2 = arith.constant 0 : index
    %1 = vector.load %arg2[%c0_1, %c0_2] : memref<1x2048xf32, #tpu.memory_space<vmem>>, vector<1x2048xf32>
    tpu.vector_store %arg2[%c0_1, %c0_2], %0 {strides = array<i32>} : memref<1x2048xf32, #tpu.memory_space<vmem>>, vector<1x2048xf32>,
    return
  }
  func.func @transform_0(%arg0: i32) -> (i32, i32) {
    %c0_i32 = arith.constant 0 : i32
    %c0_i32_0 = arith.constant 0 : i32
    return %arg0, %c0_i32 : i32, i32
  }
  func.func @transform_1(%arg0: i32) -> (i32, i32) {
    %c0_i32 = arith.constant 0 : i32
    %c0_i32_0 = arith.constant 0 : i32
    return %arg0, %c0_i32 : i32, i32
  }
}

</mosaic_0001>

<bundles_post_ra>
// kernel: fn.1
= control target key start
LH: loop header
LB: loop body
LE: loop exit
PB: predicated region body
PF: predicated region fallthrough
CT: control target
= control target key end

     0   :  { %s38_s0 = inlined_call_operand.vmem [shape: f32[1,2048], index: 0, kind: input, shape index: {}]   ;;  %s39_s1 = inlined_call_operand.vmem [shape: f32[1,2048], index: 1, kind: output, shape index: {}]  }
   0x1   :  { %v8_v0 = vld [vmem:[%s38_s0] sm:$0xff]  ;;  %v9_v1 = vld [vmem:[%s38_s0 + $0x8] sm:$0xff] }
   0x2   :  { %10 = vst [vmem:[%s39_s1] sm:$0xff] %v8_v0  ;;  %11 = vst [vmem:[%s39_s1 + $0x8] sm:$0xff] %v9_v1 }

</bundles_post_ra>
